<compile_context>
chip_gen: v5e
topology: v5e:2x2
jax: 0.10.0
libtpu: 0.0.40
codegen_flags: <defaults>
</compile_context>

<pallas_src>
import functools
import math

import jax
import jax.numpy as jnp
from jax.experimental import pallas as pl
from jax.experimental.pallas import tpu as pltpu

_DEG2RAD = math.pi / 180.0


def _row_tile(n, preferred):
    """Largest power-of-two row tile <= preferred that divides n, else full n."""
    if n <= preferred:
        return n
    t = preferred
    while t >= 8:
        if n % t == 0:
            return t
        t //= 2
    return n


# ---------------------------------------------------------------------------
# Kernel 1: sliding-window bases.  raw (TB, T) degrees -> base (TB, T) radians.
# ---------------------------------------------------------------------------
def _base_kernel(raw_l_ref, raw_p_ref, lbase_ref, pbase_ref, *,
                 window_size, missing_lambda, missing_phi):
    def windowed_base(v, missing):
        rows, seq = v.shape
        mask = (v != missing).astype(jnp.float32)
        masked = v * mask
        zpad = jnp.zeros((rows, window_size), dtype=jnp.float32)
        padded_v = jnp.concatenate([zpad, masked, zpad], axis=-1)
        padded_m = jnp.concatenate([zpad, mask, zpad], axis=-1)
        sums = jnp.zeros_like(v)
        counts = jnp.zeros_like(v)
        # static unroll: 2*W+1 lane-shifted adds on the VPU
        for i in range(2 * window_size + 1):
            sums = sums + padded_v[:, i:i + seq]
            counts = counts + padded_m[:, i:i + seq]
        counts = jnp.maximum(counts, 1.0)
        return (sums / counts) * _DEG2RAD

    lbase_ref[...] = windowed_base(raw_l_ref[...].astype(jnp.float32), missing_lambda)
    pbase_ref[...] = windowed_base(raw_p_ref[...].astype(jnp.float32), missing_phi)


def _sliding_window_bases(raw_lambda, raw_phi, *, window_size=5,
                          missing_lambda=181.0, missing_phi=91.0, row_tile=256):
    B, T = raw_lambda.shape
    tb = _row_tile(B, row_tile)
    grid = (B // tb,)
    kern = functools.partial(_base_kernel, window_size=window_size,
                             missing_lambda=float(missing_lambda),
                             missing_phi=float(missing_phi))
    row_map = lambda i: (i, 0)
    return pl.pallas_call(
        kern,
        out_shape=(jax.ShapeDtypeStruct((B, T), jnp.float32),
                   jax.ShapeDtypeStruct((B, T), jnp.float32)),
        grid=grid,
        in_specs=[pl.BlockSpec((tb, T), row_map),
                  pl.BlockSpec((tb, T), row_map)],
        out_specs=(pl.BlockSpec((tb, T), row_map),
                   pl.BlockSpec((tb, T), row_map)),
        compiler_params=pltpu.CompilerParams(dimension_semantics=("parallel",)),
    )(raw_lambda.astype(jnp.float32), raw_phi.astype(jnp.float32))


# ---------------------------------------------------------------------------
# Kernel 2: linear heads + tanh*gamma + base add, tiled over N = B*T rows.
# ---------------------------------------------------------------------------
def _delta_kernel(el_ref, ep_ref, w_ref, scal_ref, lbase_ref, pbase_ref,
                  spatio_ref, delta_ref):
    el = el_ref[...].astype(jnp.float32)          # (TN, F)
    ep = ep_ref[...].astype(jnp.float32)          # (TN, F)

    # stacked weight rows: [W_l[:, :F], W_l[:, F:], W_p[:, :F], W_p[:, F:]]
    wl_a = w_ref[0:1, :]
    wl_b = w_ref[1:2, :]
    wp_a = w_ref[2:3, :]
    wp_b = w_ref[3:4, :]

    # VPU multiply + lane reduce instead of an (TN,F)@(F,1) MXU matvec
    # (MXU would be >99% idle and force a padded (F,1) weight tile).
    s_l = jnp.sum(el * wl_a + ep * wl_b, axis=-1, keepdims=True)   # (TN, 1)
    s_p = jnp.sum(el * wp_a + ep * wp_b, axis=-1, keepdims=True)   # (TN, 1)

    b_l = scal_ref[0:1, 0:1]
    b_p = scal_ref[0:1, 1:2]
    g_l = scal_ref[0:1, 2:3]
    g_p = scal_ref[0:1, 3:4]

    delta_l = jnp.tanh(s_l + b_l) * g_l           # tanh on the EUP slot
    delta_p = jnp.tanh(s_p + b_p) * g_p

    lambda_pred = lbase_ref[...] + delta_l        # (TN, 1)
    phi_pred = pbase_ref[...] + delta_p

    spatio_ref[...] = jnp.concatenate([lambda_pred, phi_pred], axis=-1)  # (TN, 2)
    delta_ref[...] = jnp.concatenate([delta_l, delta_p], axis=-1)        # (TN, 2)


def spatio_decoder(e_lambda, e_phi, raw_lambda, raw_phi, *,
                   w_lambda, b_lambda, w_phi, b_phi,
                   gamma_lambda, gamma_phi, window_size=5, row_tile=1024):
    """e_lambda/e_phi: (N, 1, F); raw_lambda/raw_phi: (B, T) with B*T == N."""
    el = jnp.squeeze(e_lambda, axis=1).astype(jnp.float32)   # (N, F)
    ep = jnp.squeeze(e_phi, axis=1).astype(jnp.float32)      # (N, F)
    N, F = el.shape
    B, T = raw_lambda.shape
    assert B * T == N, "raw_(lambda|phi) must flatten to the e_* batch dim"

    # sliding-window bases (the torch.no_grad() branch), (N, 1) each
    lbase, pbase = _sliding_window_bases(raw_lambda, raw_phi,
                                         window_size=window_size)
    lbase = lbase.reshape(N, 1)
    pbase = pbase.reshape(N, 1)

    # pack parameters: (4, F) weight stack + (1, 4) [b_l, b_p, g_l, g_p]
    w_lambda = jnp.asarray(w_lambda, jnp.float32).reshape(1, 2 * F)
    w_phi = jnp.asarray(w_phi, jnp.float32).reshape(1, 2 * F)
    w_stack = jnp.concatenate(
        [w_lambda[:, :F], w_lambda[:, F:], w_phi[:, :F], w_phi[:, F:]], axis=0)
    scalars = jnp.stack([
        jnp.asarray(b_lambda, jnp.float32).reshape(()),
        jnp.asarray(b_phi, jnp.float32).reshape(()),
        jnp.asarray(gamma_lambda, jnp.float32).reshape(()),
        jnp.asarray(gamma_phi, jnp.float32).reshape(()),
    ]).reshape(1, 4)

    tn = _row_tile(N, row_tile)
    grid = (N // tn,)
    row_map = lambda i: (i, 0)
    const_map = lambda i: (0, 0)

    spatio_pred, delta_coord = pl.pallas_call(
        _delta_kernel,
        out_shape=(jax.ShapeDtypeStruct((N, 2), jnp.float32),
                   jax.ShapeDtypeStruct((N, 2), jnp.float32)),
        grid=grid,
        in_specs=[
            pl.BlockSpec((tn, F), row_map),     # e_lambda rows
            pl.BlockSpec((tn, F), row_map),     # e_phi rows
            pl.BlockSpec((4, F), const_map),    # stacked linear weights
            pl.BlockSpec((1, 4), const_map),    # biases + gammas
            pl.BlockSpec((tn, 1), row_map),     # lambda_base
            pl.BlockSpec((tn, 1), row_map),     # phi_base
        ],
        out_specs=(
            pl.BlockSpec((tn, 2), row_map),     # spatio_pred
            pl.BlockSpec((tn, 2), row_map),     # delta_coord
        ),
        compiler_params=pltpu.CompilerParams(dimension_semantics=("parallel",)),
    )(el, ep, w_stack, scalars, lbase, pbase)

    return spatio_pred, delta_coord


# ---------------------------------------------------------------------------
# Pure-JAX reference (mirrors the PyTorch module exactly).
# ---------------------------------------------------------------------------
def _reference(e_lambda, e_phi, raw_lambda, raw_phi,
               w_lambda, b_lambda, w_phi, b_phi, g_lambda, g_phi,
               window_size=5):
    concat = jnp.concatenate([jnp.squeeze(e_lambda, 1), jnp.squeeze(e_phi, 1)],
                             axis=-1)
    delta_l = jnp.tanh(concat @ w_lambda.T + b_lambda) * g_lambda
    delta_p = jnp.tanh(concat @ w_phi.T + b_phi) * g_phi

    def base(values, missing):
        _, T = values.shape
        mask = (values != missing).astype(jnp.float32)
        masked = values * mask
        pv = jnp.pad(masked, ((0, 0), (window_size, window_size)))
        pm = jnp.pad(mask, ((0, 0), (window_size, window_size)))
        sums = sum(pv[:, i:i + T] for i in range(2 * window_size + 1))
        counts = sum(pm[:, i:i + T] for i in range(2 * window_size + 1))
        counts = jnp.maximum(counts, 1.0)
        return jnp.deg2rad((sums / counts).reshape(-1))

    lb = base(raw_lambda, 181.0)
    pb = base(raw_phi, 91.0)
    lambda_pred = lb[:, None] + delta_l
    phi_pred = pb[:, None] + delta_p
    return (jnp.concatenate([lambda_pred, phi_pred], axis=1),
            jnp.concatenate([delta_l, delta_p], axis=1))


if __name__ == "__main__":
    B, T, F = 2, 16, 32
    N = B * T

    key = jax.random.PRNGKey(0)
    ks = jax.random.split(key, 8)

    e_lambda = jax.random.normal(ks[0], (N, 1, F), dtype=jnp.float32)
    e_phi = jax.random.normal(ks[1], (N, 1, F), dtype=jnp.float32)

    raw_lambda = jax.random.uniform(ks[2], (B, T), jnp.float32, -180.0, 180.0)
    raw_phi = jax.random.uniform(ks[3], (B, T), jnp.float32, -90.0, 90.0)
    # sprinkle in "missing" sentinel values to exercise the mask path
    raw_lambda = raw_lambda.at[0, ::5].set(181.0)
    raw_lambda = raw_lambda.at[1, 3].set(181.0)
    raw_phi = raw_phi.at[1, ::4].set(91.0)
    raw_phi = raw_phi.at[0, 7].set(91.0)

    bound = 1.0 / (2 * F) ** 0.5
    w_lambda = jax.random.uniform(ks[4], (1, 2 * F), jnp.float32, -bound, bound)
    w_phi = jax.random.uniform(ks[5], (1, 2 * F), jnp.float32, -bound, bound)
    b_lambda = jax.random.uniform(ks[6], (1,), jnp.float32, -bound, bound)
    b_phi = jax.random.uniform(ks[7], (1,), jnp.float32, -bound, bound)
    gamma_lambda = jnp.float32(0.1)
    gamma_phi = jnp.float32(0.1)

    spatio_pred, delta_coord = spatio_decoder(
        e_lambda, e_phi, raw_lambda, raw_phi,
        w_lambda=w_lambda, b_lambda=b_lambda,
        w_phi=w_phi, b_phi=b_phi,
        gamma_lambda=gamma_lambda, gamma_phi=gamma_phi)
    spatio_pred, delta_coord = jax.block_until_ready((spatio_pred, delta_coord))

    ref_spatio, ref_delta = _reference(
        e_lambda, e_phi, raw_lambda, raw_phi,
        w_lambda, b_lambda, w_phi, b_phi, gamma_lambda, gamma_phi)

    assert spatio_pred.shape == (N, 2) and delta_coord.shape == (N, 2)
    assert jnp.allclose(spatio_pred, ref_spatio, atol=1e-4, rtol=1e-4), (
        spatio_pred, ref_spatio)
    assert jnp.allclose(delta_coord, ref_delta, atol=1e-4, rtol=1e-4), (
        delta_coord, ref_delta)

    print("KERNEL_OK")
</pallas_src>

<mosaic_0001>
module attributes {stable_mosaic.version = 11 : i64} {
  func.func @_base_kernel(%arg0: i32, %arg1: memref<2x16xf32, #tpu.memory_space<vmem>>, %arg2: memref<2x16xf32, #tpu.memory_space<vmem>>, %arg3: memref<2x16xf32, #tpu.memory_space<vmem>>, %arg4: memref<2x16xf32, #tpu.memory_space<vmem>>) attributes {dimension_semantics = [#tpu.dimension_semantics<parallel>], iteration_bounds = array<i64: 1>, scalar_prefetch = 0 : i64, scratch_operands = 0 : i64, tpu.core_type = #tpu.core_type<tc>, window_params = [{transform_indices = @transform_0, window_bounds = array<i64: 2, 16>}, {transform_indices = @transform_1, window_bounds = array<i64: 2, 16>}, {transform_indices = @transform_2, window_bounds = array<i64: 2, 16>}, {transform_indices = @transform_3, window_bounds = array<i64: 2, 16>}]} {
    %c0 = arith.constant 0 : index
    %c0_0 = arith.constant 0 : index
    %0 = vector.load %arg1[%c0, %c0_0] : memref<2x16xf32, #tpu.memory_space<vmem>>, vector<2x16xf32>
    %cst = arith.constant 1.810000e+02 : f32
    %1 = vector.broadcast %cst : f32 to vector<2x16xf32>
    %2 = arith.cmpf one, %0, %1 : vector<2x16xf32>
    %3 = arith.extui %2 : vector<2x16xi1> to vector<2x16xi32>
    %4 = arith.sitofp %3 : vector<2x16xi32> to vector<2x16xf32>
    %5 = arith.mulf %0, %4 : vector<2x16xf32>
    %cst_1 = arith.constant 0.000000e+00 : f32
    %6 = vector.broadcast %cst_1 : f32 to vector<2x5xf32>
    %7 = tpu.concatenate %6, %5, %6 in 1 : vector<2x5xf32>, vector<2x16xf32>, vector<2x5xf32> -> vector<2x26xf32>
    %8 = tpu.concatenate %6, %4, %6 in 1 : vector<2x5xf32>, vector<2x16xf32>, vector<2x5xf32> -> vector<2x26xf32>
    %cst_2 = arith.constant 0.000000e+00 : f32
    %9 = vector.broadcast %cst_2 : f32 to vector<2x16xf32>
    %cst_3 = arith.constant 0.000000e+00 : f32
    %10 = vector.broadcast %cst_3 : f32 to vector<2x16xf32>
    %11 = vector.extract_strided_slice %7 {offsets = [0, 0], sizes = [2, 16], strides = [1, 1]} : vector<2x26xf32> to vector<2x16xf32>
    %12 = arith.addf %9, %11 : vector<2x16xf32>
    %13 = vector.extract_strided_slice %8 {offsets = [0, 0], sizes = [2, 16], strides = [1, 1]} : vector<2x26xf32> to vector<2x16xf32>
    %14 = arith.addf %10, %13 : vector<2x16xf32>
    %15 = vector.extract_strided_slice %7 {offsets = [0, 1], sizes = [2, 16], strides = [1, 1]} : vector<2x26xf32> to vector<2x16xf32>
    %16 = arith.addf %12, %15 : vector<2x16xf32>
    %17 = vector.extract_strided_slice %8 {offsets = [0, 1], sizes = [2, 16], strides = [1, 1]} : vector<2x26xf32> to vector<2x16xf32>
    %18 = arith.addf %14, %17 : vector<2x16xf32>
    %19 = vector.extract_strided_slice %7 {offsets = [0, 2], sizes = [2, 16], strides = [1, 1]} : vector<2x26xf32> to vector<2x16xf32>
    %20 = arith.addf %16, %19 : vector<2x16xf32>
    %21 = vector.extract_strided_slice %8 {offsets = [0, 2], sizes = [2, 16], strides = [1, 1]} : vector<2x26xf32> to vector<2x16xf32>
    %22 = arith.addf %18, %21 : vector<2x16xf32>
    %23 = vector.extract_strided_slice %7 {offsets = [0, 3], sizes = [2, 16], strides = [1, 1]} : vector<2x26xf32> to vector<2x16xf32>
    %24 = arith.addf %20, %23 : vector<2x16xf32>
    %25 = vector.extract_strided_slice %8 {offsets = [0, 3], sizes = [2, 16], strides = [1, 1]} : vector<2x26xf32> to vector<2x16xf32>
    %26 = arith.addf %22, %25 : vector<2x16xf32>
    %27 = vector.extract_strided_slice %7 {offsets = [0, 4], sizes = [2, 16], strides = [1, 1]} : vector<2x26xf32> to vector<2x16xf32>
    %28 = arith.addf %24, %27 : vector<2x16xf32>
    %29 = vector.extract_strided_slice %8 {offsets = [0, 4], sizes = [2, 16], strides = [1, 1]} : vector<2x26xf32> to vector<2x16xf32>
    %30 = arith.addf %26, %29 : vector<2x16xf32>
    %31 = vector.extract_strided_slice %7 {offsets = [0, 5], sizes = [2, 16], strides = [1, 1]} : vector<2x26xf32> to vector<2x16xf32>
    %32 = arith.addf %28, %31 : vector<2x16xf32>
    %33 = vector.extract_strided_slice %8 {offsets = [0, 5], sizes = [2, 16], strides = [1, 1]} : vector<2x26xf32> to vector<2x16xf32>
    %34 = arith.addf %30, %33 : vector<2x16xf32>
    %35 = vector.extract_strided_slice %7 {offsets = [0, 6], sizes = [2, 16], strides = [1, 1]} : vector<2x26xf32> to vector<2x16xf32>
    %36 = arith.addf %32, %35 : vector<2x16xf32>
    %37 = vector.extract_strided_slice %8 {offsets = [0, 6], sizes = [2, 16], strides = [1, 1]} : vector<2x26xf32> to vector<2x16xf32>
    %38 = arith.addf %34, %37 : vector<2x16xf32>
    %39 = vector.extract_strided_slice %7 {offsets = [0, 7], sizes = [2, 16], strides = [1, 1]} : vector<2x26xf32> to vector<2x16xf32>
    %40 = arith.addf %36, %39 : vector<2x16xf32>
    %41 = vector.extract_strided_slice %8 {offsets = [0, 7], sizes = [2, 16], strides = [1, 1]} : vector<2x26xf32> to vector<2x16xf32>
    %42 = arith.addf %38, %41 : vector<2x16xf32>
    %43 = vector.extract_strided_slice %7 {offsets = [0, 8], sizes = [2, 16], strides = [1, 1]} : vector<2x26xf32> to vector<2x16xf32>
    %44 = arith.addf %40, %43 : vector<2x16xf32>
    %45 = vector.extract_strided_slice %8 {offsets = [0, 8], sizes = [2, 16], strides = [1, 1]} : vector<2x26xf32> to vector<2x16xf32>
    %46 = arith.addf %42, %45 : vector<2x16xf32>
    %47 = vector.extract_strided_slice %7 {offsets = [0, 9], sizes = [2, 16], strides = [1, 1]} : vector<2x26xf32> to vector<2x16xf32>
    %48 = arith.addf %44, %47 : vector<2x16xf32>
    %49 = vector.extract_strided_slice %8 {offsets = [0, 9], sizes = [2, 16], strides = [1, 1]} : vector<2x26xf32> to vector<2x16xf32>
    %50 = arith.addf %46, %49 : vector<2x16xf32>
    %51 = vector.extract_strided_slice %7 {offsets = [0, 10], sizes = [2, 16], strides = [1, 1]} : vector<2x26xf32> to vector<2x16xf32>
    %52 = arith.addf %48, %51 : vector<2x16xf32>
    %53 = vector.extract_strided_slice %8 {offsets = [0, 10], sizes = [2, 16], strides = [1, 1]} : vector<2x26xf32> to vector<2x16xf32>
    %54 = arith.addf %50, %53 : vector<2x16xf32>
    %cst_4 = arith.constant 1.000000e+00 : f32
    %55 = vector.broadcast %cst_4 : f32 to vector<2x16xf32>
    %56 = arith.maximumf %54, %55 : vector<2x16xf32>
    %57 = arith.divf %52, %56 : vector<2x16xf32>
    %cst_5 = arith.constant 0.0174532924 : f32
    %58 = vector.broadcast %cst_5 : f32 to vector<2x16xf32>
    %59 = arith.mulf %57, %58 : vector<2x16xf32>
    %c0_6 = arith.constant 0 : index
    %c0_7 = arith.constant 0 : index
    %60 = vector.load %arg3[%c0_6, %c0_7] : memref<2x16xf32, #tpu.memory_space<vmem>>, vector<2x16xf32>
    tpu.vector_store %arg3[%c0_6, %c0_7], %59 {strides = array<i32>} : memref<2x16xf32, #tpu.memory_space<vmem>>, vector<2x16xf32>,
    %c0_8 = arith.constant 0 : index
    %c0_9 = arith.constant 0 : index
    %61 = vector.load %arg2[%c0_8, %c0_9] : memref<2x16xf32, #tpu.memory_space<vmem>>, vector<2x16xf32>
    %cst_10 = arith.constant 9.100000e+01 : f32
    %62 = vector.broadcast %cst_10 : f32 to vector<2x16xf32>
    %63 = arith.cmpf one, %61, %62 : vector<2x16xf32>
    %64 = arith.extui %63 : vector<2x16xi1> to vector<2x16xi32>
    %65 = arith.sitofp %64 : vector<2x16xi32> to vector<2x16xf32>
    %66 = arith.mulf %61, %65 : vector<2x16xf32>
    %cst_11 = arith.constant 0.000000e+00 : f32
    %67 = vector.broadcast %cst_11 : f32 to vector<2x5xf32>
    %68 = tpu.concatenate %67, %66, %67 in 1 : vector<2x5xf32>, vector<2x16xf32>, vector<2x5xf32> -> vector<2x26xf32>
    %69 = tpu.concatenate %67, %65, %67 in 1 : vector<2x5xf32>, vector<2x16xf32>, vector<2x5xf32> -> vector<2x26xf32>
    %cst_12 = arith.constant 0.000000e+00 : f32
    %70 = vector.broadcast %cst_12 : f32 to vector<2x16xf32>
    %cst_13 = arith.constant 0.000000e+00 : f32
    %71 = vector.broadcast %cst_13 : f32 to vector<2x16xf32>
    %72 = vector.extract_strided_slice %68 {offsets = [0, 0], sizes = [2, 16], strides = [1, 1]} : vector<2x26xf32> to vector<2x16xf32>
    %73 = arith.addf %70, %72 : vector<2x16xf32>
    %74 = vector.extract_strided_slice %69 {offsets = [0, 0], sizes = [2, 16], strides = [1, 1]} : vector<2x26xf32> to vector<2x16xf32>
    %75 = arith.addf %71, %74 : vector<2x16xf32>
    %76 = vector.extract_strided_slice %68 {offsets = [0, 1], sizes = [2, 16], strides = [1, 1]} : vector<2x26xf32> to vector<2x16xf32>
    %77 = arith.addf %73, %76 : vector<2x16xf32>
    %78 = vector.extract_strided_slice %69 {offsets = [0, 1], sizes = [2, 16], strides = [1, 1]} : vector<2x26xf32> to vector<2x16xf32>
    %79 = arith.addf %75, %78 : vector<2x16xf32>
    %80 = vector.extract_strided_slice %68 {offsets = [0, 2], sizes = [2, 16], strides = [1, 1]} : vector<2x26xf32> to vector<2x16xf32>
    %81 = arith.addf %77, %80 : vector<2x16xf32>
    %82 = vector.extract_strided_slice %69 {offsets = [0, 2], sizes = [2, 16], strides = [1, 1]} : vector<2x26xf32> to vector<2x16xf32>
    %83 = arith.addf %79, %82 : vector<2x16xf32>
    %84 = vector.extract_strided_slice %68 {offsets = [0, 3], sizes = [2, 16], strides = [1, 1]} : vector<2x26xf32> to vector<2x16xf32>
    %85 = arith.addf %81, %84 : vector<2x16xf32>
    %86 = vector.extract_strided_slice %69 {offsets = [0, 3], sizes = [2, 16], strides = [1, 1]} : vector<2x26xf32> to vector<2x16xf32>
    %87 = arith.addf %83, %86 : vector<2x16xf32>
    %88 = vector.extract_strided_slice %68 {offsets = [0, 4], sizes = [2, 16], strides = [1, 1]} : vector<2x26xf32> to vector<2x16xf32>
    %89 = arith.addf %85, %88 : vector<2x16xf32>
    %90 = vector.extract_strided_slice %69 {offsets = [0, 4], sizes = [2, 16], strides = [1, 1]} : vector<2x26xf32> to vector<2x16xf32>
    %91 = arith.addf %87, %90 : vector<2x16xf32>
    %92 = vector.extract_strided_slice %68 {offsets = [0, 5], sizes = [2, 16], strides = [1, 1]} : vector<2x26xf32> to vector<2x16xf32>
    %93 = arith.addf %89, %92 : vector<2x16xf32>
    %94 = vector.extract_strided_slice %69 {offsets = [0, 5], sizes = [2, 16], strides = [1, 1]} : vector<2x26xf32> to vector<2x16xf32>
    %95 = arith.addf %91, %94 : vector<2x16xf32>
    %96 = vector.extract_strided_slice %68 {offsets = [0, 6], sizes = [2, 16], strides = [1, 1]} : vector<2x26xf32> to vector<2x16xf32>
    %97 = arith.addf %93, %96 : vector<2x16xf32>
    %98 = vector.extract_strided_slice %69 {offsets = [0, 6], sizes = [2, 16], strides = [1, 1]} : vector<2x26xf32> to vector<2x16xf32>
    %99 = arith.addf %95, %98 : vector<2x16xf32>
    %100 = vector.extract_strided_slice %68 {offsets = [0, 7], sizes = [2, 16], strides = [1, 1]} : vector<2x26xf32> to vector<2x16xf32>
    %101 = arith.addf %97, %100 : vector<2x16xf32>
    %102 = vector.extract_strided_slice %69 {offsets = [0, 7], sizes = [2, 16], strides = [1, 1]} : vector<2x26xf32> to vector<2x16xf32>
    %103 = arith.addf %99, %102 : vector<2x16xf32>
    %104 = vector.extract_strided_slice %68 {offsets = [0, 8], sizes = [2, 16], strides = [1, 1]} : vector<2x26xf32> to vector<2x16xf32>
    %105 = arith.addf %101, %104 : vector<2x16xf32>
    %106 = vector.extract_strided_slice %69 {offsets = [0, 8], sizes = [2, 16], strides = [1, 1]} : vector<2x26xf32> to vector<2x16xf32>
    %107 = arith.addf %103, %106 : vector<2x16xf32>
    %108 = vector.extract_strided_slice %68 {offsets = [0, 9], sizes = [2, 16], strides = [1, 1]} : vector<2x26xf32> to vector<2x16xf32>
    %109 = arith.addf %105, %108 : vector<2x16xf32>
    %110 = vector.extract_strided_slice %69 {offsets = [0, 9], sizes = [2, 16], strides = [1, 1]} : vector<2x26xf32> to vector<2x16xf32>
    %111 = arith.addf %107, %110 : vector<2x16xf32>
    %112 = vector.extract_strided_slice %68 {offsets = [0, 10], sizes = [2, 16], strides = [1, 1]} : vector<2x26xf32> to vector<2x16xf32>
    %113 = arith.addf %109, %112 : vector<2x16xf32>
    %114 = vector.extract_strided_slice %69 {offsets = [0, 10], sizes = [2, 16], strides = [1, 1]} : vector<2x26xf32> to vector<2x16xf32>
    %115 = arith.addf %111, %114 : vector<2x16xf32>
    %cst_14 = arith.constant 1.000000e+00 : f32
    %116 = vector.broadcast %cst_14 : f32 to vector<2x16xf32>
    %117 = arith.maximumf %115, %116 : vector<2x16xf32>
    %118 = arith.divf %113, %117 : vector<2x16xf32>
    %cst_15 = arith.constant 0.0174532924 : f32
    %119 = vector.broadcast %cst_15 : f32 to vector<2x16xf32>
    %120 = arith.mulf %118, %119 : vector<2x16xf32>
    %c0_16 = arith.constant 0 : index
    %c0_17 = arith.constant 0 : index
    %121 = vector.load %arg4[%c0_16, %c0_17] : memref<2x16xf32, #tpu.memory_space<vmem>>, vector<2x16xf32>
    tpu.vector_store %arg4[%c0_16, %c0_17], %120 {strides = array<i32>} : memref<2x16xf32, #tpu.memory_space<vmem>>, vector<2x16xf32>,
    return
  }
  func.func @transform_0(%arg0: i32) -> (i32, i32) {
    %c0_i32 = arith.constant 0 : i32
    %c0_i32_0 = arith.constant 0 : i32
    return %arg0, %c0_i32 : i32, i32
  }
  func.func @transform_1(%arg0: i32) -> (i32, i32) {
    %c0_i32 = arith.constant 0 : i32
    %c0_i32_0 = arith.constant 0 : i32
    return %arg0, %c0_i32 : i32, i32
  }
  func.func @transform_2(%arg0: i32) -> (i32, i32) {
    %c0_i32 = arith.constant 0 : i32
    %c0_i32_0 = arith.constant 0 : i32
    return %arg0, %c0_i32 : i32, i32
  }
  func.func @transform_3(%arg0: i32) -> (i32, i32) {
    %c0_i32 = arith.constant 0 : i32
    %c0_i32_0 = arith.constant 0 : i32
    return %arg0, %c0_i32 : i32, i32
  }
}

</mosaic_0001>

<bundles_post_ra>
// kernel: tpu_custom_call.1
= control target key start
LH: loop header
LB: loop body
LE: loop exit
PB: predicated region body
PF: predicated region fallthrough
CT: control target
= control target key end

     0   :  { %9 = vsyncpa [#allocation3], 0  ;;  %s615_s0 = inlined_call_operand.hbm [shape: f32[2,16], index: 0, kind: input, shape index: {}]   ;;  %s616_s1 = inlined_call_operand.hbm [shape: f32[2,16], index: 1, kind: input, shape index: {}]   ;;  %s617_s2 = inlined_call_operand.hbm [shape: f32[2,16], index: 2, kind: output, shape index: {0}]   ;;  %s618_s3 = inlined_call_operand.hbm [shape: f32[2,16], index: 3, kind: output, shape index: {1}]  }
   0x1   :  { %10 = vsyncpa [#allocation6], 0 }
   0x2   :  { %11 = vsyncpa [#allocation4], 0 }
   0x3   :  { %12 = vsyncpa [#allocation9], 0  ;;  %s18_s14 = sshll.u32 %s615_s0, 4  ;;  %s499_s15 = smov [#allocation2]   ;;  %s19_s14 = int_to_ptr.hbm [resolvable:$true] %s18_s14 }
   0x4   :  { %s20_s16 = sshll.u32 %s499_s15, 4  ;;  %s29_s19 = sshll.u32 %s616_s1, 4  ;;  %s21_s16 = int_to_ptr.vmem [resolvable:$true] %s20_s16  ;;  %s30_s19 = int_to_ptr.hbm [resolvable:$true] %s29_s19 }
   0x5   :  { %23 = dma.hbm_to_vmem [thread:$0]  %s19_s14, 32, %s21_s16, [#allocation3]  }
   0x6   :  { %s500_s20 = smov [#allocation5]  }
   0x7   :  { %s31_s21 = sshll.u32 %s500_s20, 4  ;;  %s32_s21 = int_to_ptr.vmem [resolvable:$true] %s31_s21 }
   0x8   :  { %34 = dma.hbm_to_vmem [thread:$0]  %s30_s19, 32, %s32_s21, [#allocation6]  }
   0x9   :  { %491 = dma.done.wait [#allocation3], 32  }
   0xa   :  { %492 = vsyncadd [#allocation3], 4294967264 }
   0xb   :  { %493 = dma.done.wait [#allocation6], 32  }
   0xc   :  { %494 = vsyncadd [#allocation6], 4294967264  ;;  %v43_v0 = vld [vmem:[#allocation2] sm:$0x3]  ;;  %v165_v1 = vld [vmem:[#allocation5] sm:$0x3] }
   0xd   :  { %vm44_vm0 = vcmp.ne.f32.partialorder %v43_v0, 181.0  ;;  %vm166_vm1 = vcmp.ne.f32.partialorder %v165_v1, 91.0  ;;  %v501_v2 = vmov 0.0   ;;  %s502_s0 = smov 5   ;;  %vm52_vm2 = vcmask 39936   ;;  %s503_s1 = smov 126  }
   0xe   :  { %v318_v3 = vsel %vm44_vm0, 1.0, %v501_v2  ;;  %v319_v4 = vsel %vm166_vm1, 1.0, %v501_v2  ;;  %vm54_vm3 = vcmask 171008   ;;  %s504_s22 = smov 127   ;;  %s505_s23 = smov 123   ;;  %vm163_vm11 = vcmask 123904  }
   0xf   :  { %v336_v5 = vpack.i.bf16 %v319_v4, %v318_v3  ;;  %v169_v6 = vmul.f32 %v319_v4, %v165_v1  ;;  %v47_v7 = vmul.f32 %v318_v3, %v43_v0  ;;  %s506_s24 = smov 122   ;;  %s507_s25 = smov 125  }
  0x10   :  { %s508_s26 = smov 119   ;;  %s509_s27 = smov 120  }
  0x11   :  { %337 = vrot.lane.b32.xlu0 %v336_v5, %s502_s0  ;;  %171 = vrot.lane.b32.xlu2 %v169_v6, %s502_s0  ;;  %s510_s28 = smov 124   ;;  %s511_s29 = smov 121  }
  0x12   :  { %s512_s30 = smov 118   ;;  %s513_s4 = smov [#allocation8]  }
  0x13   :  { %s300_s5 = sshll.u32 %s513_s4, 4  ;;  %s302_s8 = sshll.u32 %s618_s3, 4  ;;  %s301_s5 = int_to_ptr.vmem [resolvable:$true] %s300_s5  ;;  %s303_s8 = int_to_ptr.hbm [resolvable:$true] %s302_s8 }
  0x14   :  { %s514_s9 = smov [#allocation7]   ;;  %s291_s3 = sshll.u32 %s617_s2, 4  ;;  %s292_s3 = int_to_ptr.hbm [resolvable:$true] %s291_s3 }
  0x15   :  { %s289_s10 = sshll.u32 %s514_s9, 4  ;;  %s290_s10 = int_to_ptr.vmem [resolvable:$true] %s289_s10 }
  0x19   :  { %49 = vrot.lane.b32.xlu0 %v47_v7, %s502_s0 }
  0x6b   :  { %v172_v19 = vpop.permute.xlu2 %171 }
  0x6c   :  { %v174_v20 = vsel %vm52_vm2, 0.0, %v172_v19 }
  0x6d   :  { %v567_v21 = vsel %vm54_vm3, %v174_v20, 0.0 }
  0x83   :  { %v338_v8 = vpop.permute.xlu0 %337 }
  0x84   :  { %v340_v9 = vunpack.i.h.bf16 %v338_v8  ;;  %v339_v10 = vunpack.i.l.bf16 %v338_v8 }
  0x86   :  { %v180_v11 = vsel %vm52_vm2, 0.0, %v340_v9  ;;  %v60_v12 = vsel %vm52_vm2, 0.0, %v339_v10 }
  0x87   :  { %v181_v13 = vsel %vm54_vm3, %v180_v11, 0.0  ;;  %v545_v14 = vsel %vm54_vm3, %v60_v12, 0.0 }
  0x88   :  { %v346_v15 = vpack.i.bf16 %v181_v13, %v545_v14 }
  0x8a   :  { %347 = vrot.lane.b32.xlu2 %v346_v15, %s503_s1  ;;  %342 = vrot.lane.b32.xlu1 %v346_v15, %s504_s22 }
  0x8b   :  { %362 = vrot.lane.b32.xlu0 %v346_v15, %s505_s23  ;;  %v50_v16 = vpop.permute.xlu0 %49 }
  0x8c   :  { %v53_v17 = vsel %vm52_vm2, 0.0, %v50_v16 }
  0x8d   :  { %v555_v18 = vsel %vm54_vm3, %v53_v17, 0.0 }
  0x92   :  { %367 = vrot.lane.b32.xlu2 %v346_v15, %s506_s24  ;;  %352 = vrot.lane.b32.xlu1 %v346_v15, %s507_s25 }
  0x93   :  { %382 = vrot.lane.b32.xlu0 %v346_v15, %s508_s26 }
  0x9a   :  { %377 = vrot.lane.b32.xlu2 %v346_v15, %s509_s27  ;;  %357 = vrot.lane.b32.xlu1 %v346_v15, %s510_s28 }
  0x9b   :  { %82 = vrot.lane.b32.xlu0 %v555_v18, %s507_s25 }
  0xa2   :  { %372 = vrot.lane.b32.xlu1 %v346_v15, %s511_s29  ;;  %74 = vrot.lane.b32.xlu2 %v555_v18, %s503_s1 }
  0xa3   :  { %90 = vrot.lane.b32.xlu0 %v555_v18, %s510_s28 }
  0xaa   :  { %387 = vrot.lane.b32.xlu1 %v346_v15, %s512_s30  ;;  %98 = vrot.lane.b32.xlu2 %v555_v18, %s505_s23 }
  0xab   :  { %114 = vrot.lane.b32.xlu0 %v555_v18, %s511_s29 }
  0xb2   :  { %185 = vrot.lane.b32.xlu2 %v567_v21, %s504_s22  ;;  %65 = vrot.lane.b32.xlu1 %v555_v18, %s504_s22 }
  0xb3   :  { %194 = vrot.lane.b32.xlu0 %v567_v21, %s503_s1 }
  0xba   :  { %210 = vrot.lane.b32.xlu2 %v567_v21, %s510_s28  ;;  %106 = vrot.lane.b32.xlu1 %v555_v18, %s506_s24 }
  0xbb   :  { %218 = vrot.lane.b32.xlu0 %v567_v21, %s505_s23 }
  0xc2   :  { %234 = vrot.lane.b32.xlu2 %v567_v21, %s511_s29  ;;  %202 = vrot.lane.b32.xlu1 %v567_v21, %s507_s25 }
  0xc3   :  { %122 = vrot.lane.b32.xlu0 %v555_v18, %s509_s27 }
  0xca   :  { %130 = vrot.lane.b32.xlu2 %v555_v18, %s508_s26  ;;  %226 = vrot.lane.b32.xlu1 %v567_v21, %s506_s24 }
  0xcb   :  { %250 = vrot.lane.b32.xlu0 %v567_v21, %s508_s26 }
  0xd2   :  { %258 = vrot.lane.b32.xlu2 %v567_v21, %s512_s30  ;;  %242 = vrot.lane.b32.xlu1 %v567_v21, %s509_s27 }
  0xda   :  { %138 = vrot.lane.b32.xlu1 %v555_v18, %s512_s30 }
  0xe4   :  { %v348_v22 = vpop.permute.xlu2 %347 }
  0xe5   :  { %v350_v32 = vunpack.i.h.bf16 %v348_v22  ;;  %v349_v40 = vunpack.i.l.bf16 %v348_v22 }
  0xec   :  { %v368_v23 = vpop.permute.xlu2 %367 }
  0xed   :  { %v370_v53 = vunpack.i.h.bf16 %v368_v23  ;;  %v369_v58 = vunpack.i.l.bf16 %v368_v23 }
  0xf4   :  { %v378_v26 = vpop.permute.xlu2 %377 }
  0xf5   :  { %v380_v62 = vunpack.i.h.bf16 %v378_v26  ;;  %v379_v4 = vunpack.i.l.bf16 %v378_v26 }
  0xfc   :  { %v343_v24 = vpop.permute.xlu1 %342  ;;  %v75_v33 = vpop.permute.xlu2 %74 }
  0xfd   :  { %v363_v25 = vpop.permute.xlu0 %362  ;;  %v345_v29 = vunpack.i.h.bf16 %v343_v24  ;;  %v344_v31 = vunpack.i.l.bf16 %v343_v24 }
  0xfe   :  { %v365_v46 = vunpack.i.h.bf16 %v363_v25  ;;  %v364_v54 = vunpack.i.l.bf16 %v363_v25 }
  0xff   :  { %v193_v30 = vadd.f32 %v345_v29, %v181_v13  ;;  %v73_v37 = vadd.f32 %v344_v31, %v545_v14 }
 0x101   :  { %v201_v38 = vadd.f32 %v350_v32, %v193_v30  ;;  %v81_v43 = vadd.f32 %v349_v40, %v73_v37 }
 0x104   :  { %v353_v27 = vpop.permute.xlu1 %352  ;;  %v99_v50 = vpop.permute.xlu2 %98 }
 0x105   :  { %v383_v28 = vpop.permute.xlu0 %382  ;;  %v355_v34 = vunpack.i.h.bf16 %v353_v27  ;;  %v354_v41 = vunpack.i.l.bf16 %v353_v27 }
 0x106   :  { %v385_v5 = vunpack.i.h.bf16 %v383_v28  ;;  %v384_v10 = vunpack.i.l.bf16 %v383_v28 }
 0x107   :  { %v209_v42 = vadd.f32 %v355_v34, %v201_v38  ;;  %v89_v47 = vadd.f32 %v354_v41, %v81_v43 }
 0x10c   :  { %v358_v35 = vpop.permute.xlu1 %357  ;;  %v186_v1 = vpop.permute.xlu2 %185 }
 0x10d   :  { %v83_v36 = vpop.permute.xlu0 %82  ;;  %v360_v39 = vunpack.i.h.bf16 %v358_v35  ;;  %v359_v44 = vunpack.i.l.bf16 %v358_v35  ;;  %v188_v23 = vadd.f32 %v186_v1, %v567_v21 }
 0x10f   :  { %v217_v45 = vadd.f32 %v360_v39, %v209_v42  ;;  %v97_v51 = vadd.f32 %v359_v44, %v89_v47 }
 0x111   :  { %v225_v52 = vadd.f32 %v365_v46, %v217_v45  ;;  %v105_v56 = vadd.f32 %v364_v54, %v97_v51 }
 0x113   :  { %v233_v57 = vadd.f32 %v370_v53, %v225_v52  ;;  %v113_v63 = vadd.f32 %v369_v58, %v105_v56 }
 0x114   :  { %v373_v48 = vpop.permute.xlu1 %372  ;;  %v211_v15 = vpop.permute.xlu2 %210 }
 0x115   :  { %v91_v49 = vpop.permute.xlu0 %90  ;;  %v375_v55 = vunpack.i.h.bf16 %v373_v48  ;;  %v374_v59 = vunpack.i.l.bf16 %v373_v48 }
 0x117   :  { %v241_v60 = vadd.f32 %v375_v55, %v233_v57  ;;  %v121_v2 = vadd.f32 %v374_v59, %v113_v63 }
 0x119   :  { %v249_v3 = vadd.f32 %v380_v62, %v241_v60  ;;  %v129_v7 = vadd.f32 %v379_v4, %v121_v2 }
 0x11b   :  { %v257_v8 = vadd.f32 %v385_v5, %v249_v3  ;;  %v137_v13 = vadd.f32 %v384_v10, %v129_v7 }
 0x11c   :  { %v388_v61 = vpop.permute.xlu1 %387  ;;  %v235_v28 = vpop.permute.xlu2 %234 }
 0x11d   :  { %v115_v0 = vpop.permute.xlu0 %114  ;;  %v390_v6 = vunpack.i.h.bf16 %v388_v61  ;;  %v389_v11 = vunpack.i.l.bf16 %v388_v61 }
 0x11f   :  { %v265_v12 = vadd.f32 %v390_v6, %v257_v8  ;;  %v145_v16 = vadd.f32 %v389_v11, %v137_v13 }
 0x121   :  { %v266_v17 = vmax.f32 %v265_v12, 1.0  ;;  %v593_v22 = vmax.f32 %v145_v16, 1.0 }
 0x123   :  { %391 = vrcp.f32 %v266_v17  ;;  %v278_v51 = vand.u32 2147483648, %v266_v17  ;;  %vm272_vm5 = vweird.f32 %v266_v17  ;;  %v276_v53 = vand.u32 2147483647, %v266_v17 }
 0x124   :  { %v66_v9 = vpop.permute.xlu1 %65  ;;  %393 = vrcp.f32 %v593_v22  ;;  %v131_v41 = vpop.permute.xlu2 %130  ;;  %v158_v60 = vand.u32 2147483648, %v593_v22  ;;  %vm152_vm9 = vweird.f32 %v593_v22  ;;  %v156_v62 = vand.u32 2147483647, %v593_v22 }
 0x125   :  { %v195_v14 = vpop.permute.xlu0 %194  ;;  %v68_v20 = vadd.f32 %v66_v9, %v555_v18  ;;  %v279_v59 = vor.u32 1.1754944e-38, %v278_v51  ;;  %vm277_vm8 = vcmp.eq.f32.partialorder %v276_v53, 8.507059e+37 }
 0x126   :  { %v197_v26 = vadd.f32 %v195_v14, %v188_v23  ;;  %v159_v5 = vor.u32 1.1754944e-38, %v158_v60  ;;  %vm157_vm12 = vcmp.eq.f32.partialorder %v156_v62, 8.507059e+37 }
 0x127   :  { %v77_v24 = vadd.f32 %v75_v33, %v68_v20 }
 0x129   :  { %v392_v27 = vpop.eup %391  ;;  %v85_v30 = vadd.f32 %v83_v36, %v77_v24 }
 0x12a   :  { %v268_v32 = vmul.f32 %v392_v27, %v266_v17  ;;  %v394_v34 = vpop.eup %393  ;;  %vm273_vm4 = vweird.f32 %v392_v27 }
 0x12b   :  { %v93_v35 = vadd.f32 %v91_v49, %v85_v30  ;;  %v148_v38 = vmul.f32 %v394_v34, %v593_v22  ;;  %vm274_vm6 = vmor %vm272_vm5, %vm273_vm4  ;;  %vm153_vm7 = vweird.f32 %v394_v34 }
 0x12c   :  { %v107_v19 = vpop.permute.xlu1 %106  ;;  %v269_v18 = vsub.f32 1.0, %v268_v32  ;;  %v259_v58 = vpop.permute.xlu2 %258  ;;  %vm601_vm10 = vmor %vm152_vm9, %vm153_vm7 }
 0x12d   :  { %v219_v25 = vpop.permute.xlu0 %218  ;;  %v101_v21 = vadd.f32 %v99_v50, %v93_v35  ;;  %v149_v44 = vsub.f32 1.0, %v148_v38 }
 0x12e   :  { %v270_v43 = vmul.f32 %v392_v27, %v269_v18 }
 0x12f   :  { %v109_v45 = vadd.f32 %v107_v19, %v101_v21  ;;  %v150_v36 = vmul.f32 %v394_v34, %v149_v44 }
 0x130   :  { %v271_v47 = vadd.f32 %v392_v27, %v270_v43 }
 0x131   :  { %v117_v49 = vadd.f32 %v115_v0, %v109_v45  ;;  %v151_v57 = vadd.f32 %v394_v34, %v150_v36 }
 0x132   :  { %v275_v56 = vsel %vm274_vm6, %v392_v27, %v271_v47 }
 0x133   :  { %v280_v63 = vsel %vm277_vm8, %v279_v59, %v275_v56  ;;  %v155_v3 = vsel %vm601_vm10, %v394_v34, %v151_v57 }
 0x134   :  { %v203_v29 = vpop.permute.xlu1 %202  ;;  %v160_v8 = vsel %vm157_vm12, %v159_v5, %v155_v3 }
 0x135   :  { %v205_v31 = vadd.f32 %v203_v29, %v197_v26  ;;  %v123_v39 = vpop.permute.xlu0 %122 }
 0x136   :  { %v125_v50 = vadd.f32 %v123_v39, %v117_v49 }
 0x137   :  { %v213_v37 = vadd.f32 %v211_v15, %v205_v31 }
 0x138   :  { %v133_v2 = vadd.f32 %v131_v41, %v125_v50 }
 0x139   :  { %v221_v33 = vadd.f32 %v219_v25, %v213_v37 }
 0x13c   :  { %v227_v40 = vpop.permute.xlu1 %226 }
 0x13d   :  { %v229_v42 = vadd.f32 %v227_v40, %v221_v33  ;;  %v251_v54 = vpop.permute.xlu0 %250 }
 0x13f   :  { %v237_v46 = vadd.f32 %v235_v28, %v229_v42 }
 0x144   :  { %v243_v48 = vpop.permute.xlu1 %242 }
 0x145   :  { %v245_v52 = vadd.f32 %v243_v48, %v237_v46 }
 0x147   :  { %v253_v55 = vadd.f32 %v251_v54, %v245_v52 }
 0x149   :  { %v261_v61 = vadd.f32 %v259_v58, %v253_v55 }
 0x14b   :  { %v281_v1 = vmul.f32 %v280_v63, %v261_v61 }
 0x14c   :  { %v139_v4 = vpop.permute.xlu1 %138 }
 0x14d   :  { %v282_v6 = vmul.f32 0.017453292, %v281_v1  ;;  %v141_v7 = vadd.f32 %v139_v4, %v133_v2 }
 0x14f   :  { %v161_v9 = vmul.f32 %v160_v8, %v141_v7  ;;  %283 = vst.msk [vmem:[#allocation8] sm:$0x3] %vm163_vm11, %v282_v6 }
 0x150   :  { %305 = dma.vmem_to_hbm [thread:$0]  %s301_s5, 32, %s303_s8, [#allocation9]  }
 0x151   :  { %v162_v10 = vmul.f32 0.017453292, %v161_v9 }
 0x153   :  { %164 = vst.msk [vmem:[#allocation7] sm:$0x3] %vm163_vm11, %v162_v10 }
 0x154   :  { %294 = dma.vmem_to_hbm [thread:$0]  %s290_s10, 32, %s292_s3, [#allocation4]  }
 0x155   :  { %495 = dma.done.wait [#allocation4], 32  }
 0x156   :  { %496 = vsyncadd [#allocation4], 4294967264 }
 0x157   :  { %497 = dma.done.wait [#allocation9], 32  }
 0x158   :  { %498 = vsyncadd [#allocation9], 4294967264 }
 0x159   :  { %314 = vsyncpa [#allocation3], 1 }
 0x15a   :  { %315 = vsyncpa [#allocation6], 1 }
 0x15b   :  { %316 = vsyncpa [#allocation4], 1 }
 0x15c   :  { %317 = vsyncpa [#allocation9], 1 }

</bundles_post_ra>
